<compile_context>
chip_gen: v6e
topology: v6e:2x2x1
jax: 0.10.0
libtpu: 0.0.40
codegen_flags: <defaults>
</compile_context>

<pallas_src>
import jax
import jax.numpy as jnp
from jax.experimental import pallas as pl
from jax.experimental.pallas import tpu as pltpu


def mlp_kernel(x_ref, w1_ref, b1_ref, w2_ref, b2_ref, w3_ref, b3_ref, out_ref):
    # One batch tile per grid step; all three matmuls, the ReLUs and the
    # log-softmax are fused.  MXU accumulates in f32; all elementwise math
    # (bias add, ReLU, exp/log) is done in f32 regardless of input dtype.
    x = x_ref[...]

    h = jnp.dot(x, w1_ref[...], preferred_element_type=jnp.float32)
    h = jnp.maximum(h + b1_ref[...], 0.0)                     # activation = ReLU

    h = jnp.dot(h.astype(w2_ref.dtype), w2_ref[...],
                preferred_element_type=jnp.float32)
    h = jnp.maximum(h + b2_ref[...], 0.0)

    logits = jnp.dot(h.astype(w3_ref.dtype), w3_ref[...],
                     preferred_element_type=jnp.float32) + b3_ref[...]

    # Numerically stable LogSoftmax along dim=1 (classes).  exp/log run on the
    # otherwise-idle EUP slot.
    m = jnp.max(logits, axis=1, keepdims=True)
    shifted = logits - m
    lse = jnp.log(jnp.sum(jnp.exp(shifted), axis=1, keepdims=True))
    out_ref[...] = (shifted - lse).astype(out_ref.dtype)


def mlp_forward(x, w1, b1, w2, b2, w3, b3, *, tile_b=None, use_bf16_matmul=False):
    batch, n_features = x.shape
    n_hidden = w1.shape[1]
    n_hidden2 = w2.shape[1]
    n_classes = w3.shape[1]

    # Batch tile: multiple of 8 sublanes, capped so double-buffered activation
    # tiles stay well under the v7x 64 MiB VMEM (and default scoped limits).
    if tile_b is None:
        tile_b = min(batch, 1024)
    tile_b = max(8, (tile_b // 8) * 8)

    n_tiles = pl.cdiv(batch, tile_b)
    padded = n_tiles * tile_b
    if padded != batch:
        x = jnp.pad(x, ((0, padded - batch), (0, 0)))

    if use_bf16_matmul:
        # Halve HBM traffic for the dominant x stream and feed the bf16 MXU
        # natively (v6e/v7x).  Biases / elementwise math stay f32.
        x = x.astype(jnp.bfloat16)
        w1 = w1.astype(jnp.bfloat16)
        w2 = w2.astype(jnp.bfloat16)
        w3 = w3.astype(jnp.bfloat16)

    # Grid-invariant operands: explicit (0, 0) index_map so weights/biases are
    # DMAed once and remain VMEM-resident across all batch tiles.
    def invariant(a):
        return pl.BlockSpec(a.shape, lambda i: (0,) * a.ndim)

    flops = 2 * padded * (n_features * n_hidden
                          + n_hidden * n_hidden2
                          + n_hidden2 * n_classes)
    transcendentals = 2 * padded * n_classes  # exp + log per logit row
    bytes_accessed = int(
        x.size * x.dtype.itemsize
        + sum(a.size * a.dtype.itemsize for a in (w1, b1, w2, b2, w3, b3))
        + padded * n_classes * 4
    )

    out = pl.pallas_call(
        mlp_kernel,
        out_shape=jax.ShapeDtypeStruct((padded, n_classes), jnp.float32),
        grid=(n_tiles,),
        in_specs=[
            pl.BlockSpec((tile_b, n_features), lambda i: (i, 0)),
            invariant(w1), invariant(b1),
            invariant(w2), invariant(b2),
            invariant(w3), invariant(b3),
        ],
        # n_classes (=8) < 128 lanes -> masked stores; cheap at this width.
        out_specs=pl.BlockSpec((tile_b, n_classes), lambda i: (i, 0)),
        compiler_params=pltpu.CompilerParams(
            dimension_semantics=("parallel",)),
        cost_estimate=pl.CostEstimate(
            flops=flops,
            transcendentals=transcendentals,
            bytes_accessed=bytes_accessed),
    )(x, w1, b1, w2, b2, w3, b3)

    return out[:batch]


def init_params(key, n_features, n_hidden, n_classes):
    """Deterministic init mimicking nn.Linear's U(-1/sqrt(fan_in), +1/sqrt(fan_in))."""
    def linear(k, fan_in, fan_out):
        kw, kb = jax.random.split(k)
        bound = 1.0 / jnp.sqrt(fan_in)
        w = jax.random.uniform(kw, (fan_in, fan_out), jnp.float32, -bound, bound)
        b = jax.random.uniform(kb, (1, fan_out), jnp.float32, -bound, bound)
        return w, b

    k1, k2, k3 = jax.random.split(key, 3)
    n_hidden2 = n_hidden // 2
    w1, b1 = linear(k1, n_features, n_hidden)
    w2, b2 = linear(k2, n_hidden, n_hidden2)
    w3, b3 = linear(k3, n_hidden2, n_classes)
    return w1, b1, w2, b2, w3, b3


if __name__ == "__main__":
    # parameter = {'n_input_nodes': 32, 'n_hidden_nodes': 32,
    #              'n_output_nodes': 8, 'activation_fn': ReLU}
    batch = 70          # non-multiple of the tile -> exercises padding path
    n_features = 32
    n_hidden = 32
    n_classes = 8
    tile_b = 16         # small tile so the demo exercises a multi-step grid

    key = jax.random.PRNGKey(0)
    kx, kp = jax.random.split(key)
    x = jax.random.normal(kx, (batch, n_features), jnp.float32)
    w1, b1, w2, b2, w3, b3 = init_params(kp, n_features, n_hidden, n_classes)

    out = mlp_forward(x, w1, b1, w2, b2, w3, b3, tile_b=tile_b,
                      use_bf16_matmul=False)
    jax.block_until_ready(out)

    # sanity check against pure-JAX reference
    def ref(xv):
        h = jnp.maximum(xv @ w1 + b1, 0.0)
        h = jnp.maximum(h @ w2 + b2, 0.0)
        logits = h @ w3 + b3
        return jax.nn.log_softmax(logits, axis=1)

    assert out.shape == (batch, n_classes)
    assert jnp.allclose(out, ref(x), atol=1e-5), "mismatch vs reference"
    print("KERNEL_OK")
</pallas_src>

<mosaic_0001>
module attributes {stable_mosaic.version = 11 : i64} {
  func.func @mlp_kernel(%arg0: i32, %arg1: memref<16x32xf32, #tpu.memory_space<vmem>>, %arg2: memref<32x32xf32, #tpu.memory_space<vmem>>, %arg3: memref<1x32xf32, #tpu.memory_space<vmem>>, %arg4: memref<32x16xf32, #tpu.memory_space<vmem>>, %arg5: memref<1x16xf32, #tpu.memory_space<vmem>>, %arg6: memref<16x8xf32, #tpu.memory_space<vmem>>, %arg7: memref<1x8xf32, #tpu.memory_space<vmem>>, %arg8: memref<16x8xf32, #tpu.memory_space<vmem>>) attributes {dimension_semantics = [#tpu.dimension_semantics<parallel>], iteration_bounds = array<i64: 5>, scalar_prefetch = 0 : i64, scratch_operands = 0 : i64, tpu.core_type = #tpu.core_type<tc>, window_params = [{transform_indices = @transform_0, window_bounds = array<i64: 16, 32>}, {pipeline_mode = #tpu.pipeline_mode<synchronous>, transform_indices = @transform_1, window_bounds = array<i64: 32, 32>}, {pipeline_mode = #tpu.pipeline_mode<synchronous>, transform_indices = @transform_2, window_bounds = array<i64: 1, 32>}, {pipeline_mode = #tpu.pipeline_mode<synchronous>, transform_indices = @transform_3, window_bounds = array<i64: 32, 16>}, {pipeline_mode = #tpu.pipeline_mode<synchronous>, transform_indices = @transform_4, window_bounds = array<i64: 1, 16>}, {pipeline_mode = #tpu.pipeline_mode<synchronous>, transform_indices = @transform_5, window_bounds = array<i64: 16, 8>}, {pipeline_mode = #tpu.pipeline_mode<synchronous>, transform_indices = @transform_6, window_bounds = array<i64: 1, 8>}, {transform_indices = @transform_7, window_bounds = array<i64: 16, 8>}]} {
    %c0 = arith.constant 0 : index
    %c0_0 = arith.constant 0 : index
    %0 = vector.load %arg1[%c0, %c0_0] : memref<16x32xf32, #tpu.memory_space<vmem>>, vector<16x32xf32>
    %c0_1 = arith.constant 0 : index
    %c0_2 = arith.constant 0 : index
    %1 = vector.load %arg2[%c0_1, %c0_2] : memref<32x32xf32, #tpu.memory_space<vmem>>, vector<32x32xf32>
    %cst = arith.constant dense<0.000000e+00> : vector<16x32xf32>
    %2 = tpu.matmul %0, %1, %cst {dimension_numbers = #tpu.dot_dimension_numbers<[1], [0], [0], [1], [0, 0, 1, 1], [], []>} : vector<16x32xf32>, vector<32x32xf32>, vector<16x32xf32> -> vector<16x32xf32>
    %c0_3 = arith.constant 0 : index
    %c0_4 = arith.constant 0 : index
    %3 = vector.load %arg3[%c0_3, %c0_4] : memref<1x32xf32, #tpu.memory_space<vmem>>, vector<1x32xf32>
    %4 = vector.broadcast %3 : vector<1x32xf32> to vector<16x32xf32>
    %5 = arith.addf %2, %4 : vector<16x32xf32>
    %cst_5 = arith.constant 0.000000e+00 : f32
    %6 = vector.broadcast %cst_5 : f32 to vector<16x32xf32>
    %7 = arith.maximumf %5, %6 : vector<16x32xf32>
    %c0_6 = arith.constant 0 : index
    %c0_7 = arith.constant 0 : index
    %8 = vector.load %arg4[%c0_6, %c0_7] : memref<32x16xf32, #tpu.memory_space<vmem>>, vector<32x16xf32>
    %cst_8 = arith.constant dense<0.000000e+00> : vector<16x16xf32>
    %9 = tpu.matmul %7, %8, %cst_8 {dimension_numbers = #tpu.dot_dimension_numbers<[1], [0], [0], [1], [0, 0, 1, 1], [], []>} : vector<16x32xf32>, vector<32x16xf32>, vector<16x16xf32> -> vector<16x16xf32>
    %c0_9 = arith.constant 0 : index
    %c0_10 = arith.constant 0 : index
    %10 = vector.load %arg5[%c0_9, %c0_10] : memref<1x16xf32, #tpu.memory_space<vmem>>, vector<1x16xf32>
    %11 = vector.broadcast %10 : vector<1x16xf32> to vector<16x16xf32>
    %12 = arith.addf %9, %11 : vector<16x16xf32>
    %cst_11 = arith.constant 0.000000e+00 : f32
    %13 = vector.broadcast %cst_11 : f32 to vector<16x16xf32>
    %14 = arith.maximumf %12, %13 : vector<16x16xf32>
    %c0_12 = arith.constant 0 : index
    %c0_13 = arith.constant 0 : index
    %15 = vector.load %arg6[%c0_12, %c0_13] : memref<16x8xf32, #tpu.memory_space<vmem>>, vector<16x8xf32>
    %cst_14 = arith.constant dense<0.000000e+00> : vector<16x8xf32>
    %16 = tpu.matmul %14, %15, %cst_14 {dimension_numbers = #tpu.dot_dimension_numbers<[1], [0], [0], [1], [0, 0, 1, 1], [], []>} : vector<16x16xf32>, vector<16x8xf32>, vector<16x8xf32> -> vector<16x8xf32>
    %c0_15 = arith.constant 0 : index
    %c0_16 = arith.constant 0 : index
    %17 = vector.load %arg7[%c0_15, %c0_16] : memref<1x8xf32, #tpu.memory_space<vmem>>, vector<1x8xf32>
    %18 = vector.broadcast %17 : vector<1x8xf32> to vector<16x8xf32>
    %19 = arith.addf %16, %18 : vector<16x8xf32>
    %cst_17 = arith.constant dense<0xFF800000> : vector<16xf32>
    %20 = vector.multi_reduction <maximumf>, %19, %cst_17 [1] : vector<16x8xf32> to vector<16xf32>
    %21 = vector.shape_cast %20 : vector<16xf32> to vector<16x1xf32>
    %22 = vector.broadcast %21 : vector<16x1xf32> to vector<16x8xf32>
    %23 = arith.subf %19, %22 : vector<16x8xf32>
    %24 = math.exp %23 : vector<16x8xf32>
    %cst_18 = arith.constant dense<0.000000e+00> : vector<16xf32>
    %25 = vector.multi_reduction <add>, %24, %cst_18 [1] : vector<16x8xf32> to vector<16xf32>
    %26 = vector.shape_cast %25 : vector<16xf32> to vector<16x1xf32>
    %27 = math.log %26 : vector<16x1xf32>
    %28 = vector.broadcast %27 : vector<16x1xf32> to vector<16x8xf32>
    %29 = arith.subf %23, %28 : vector<16x8xf32>
    %c0_19 = arith.constant 0 : index
    %c0_20 = arith.constant 0 : index
    %30 = vector.load %arg8[%c0_19, %c0_20] : memref<16x8xf32, #tpu.memory_space<vmem>>, vector<16x8xf32>
    tpu.vector_store %arg8[%c0_19, %c0_20], %29 {strides = array<i32>} : memref<16x8xf32, #tpu.memory_space<vmem>>, vector<16x8xf32>,
    return
  }
  func.func @transform_0(%arg0: i32) -> (i32, i32) {
    %c0_i32 = arith.constant 0 : i32
    %c0_i32_0 = arith.constant 0 : i32
    return %arg0, %c0_i32 : i32, i32
  }
  func.func @transform_1(%arg0: i32) -> (i32, i32) {
    %c0_i32 = arith.constant 0 : i32
    %c0_i32_0 = arith.constant 0 : i32
    %c0_i32_1 = arith.constant 0 : i32
    return %c0_i32, %c0_i32_0 : i32, i32
  }
  func.func @transform_2(%arg0: i32) -> (i32, i32) {
    %c0_i32 = arith.constant 0 : i32
    %c0_i32_0 = arith.constant 0 : i32
    %c0_i32_1 = arith.constant 0 : i32
    return %c0_i32, %c0_i32_0 : i32, i32
  }
  func.func @transform_3(%arg0: i32) -> (i32, i32) {
    %c0_i32 = arith.constant 0 : i32
    %c0_i32_0 = arith.constant 0 : i32
    %c0_i32_1 = arith.constant 0 : i32
    return %c0_i32, %c0_i32_0 : i32, i32
  }
  func.func @transform_4(%arg0: i32) -> (i32, i32) {
    %c0_i32 = arith.constant 0 : i32
    %c0_i32_0 = arith.constant 0 : i32
    %c0_i32_1 = arith.constant 0 : i32
    return %c0_i32, %c0_i32_0 : i32, i32
  }
  func.func @transform_5(%arg0: i32) -> (i32, i32) {
    %c0_i32 = arith.constant 0 : i32
    %c0_i32_0 = arith.constant 0 : i32
    %c0_i32_1 = arith.constant 0 : i32
    return %c0_i32, %c0_i32_0 : i32, i32
  }
  func.func @transform_6(%arg0: i32) -> (i32, i32) {
    %c0_i32 = arith.constant 0 : i32
    %c0_i32_0 = arith.constant 0 : i32
    %c0_i32_1 = arith.constant 0 : i32
    return %c0_i32, %c0_i32_0 : i32, i32
  }
  func.func @transform_7(%arg0: i32) -> (i32, i32) {
    %c0_i32 = arith.constant 0 : i32
    %c0_i32_0 = arith.constant 0 : i32
    return %arg0, %c0_i32 : i32, i32
  }
}

</mosaic_0001>

<bundles_post_ra>
// kernel: tpu_custom_call.1
= control target key start
LH: loop header
LB: loop body
LE: loop exit
PB: predicated region body
PF: predicated region fallthrough
CT: control target
= control target key end

     0   :  { %s776_s24 = smov 0   ;;  %s849_s0 = inlined_call_operand.vmem [shape: f32[80,32], index: 0, kind: input, shape index: {}]   ;;  %s850_s1 = inlined_call_operand.vmem [shape: f32[32,32], index: 1, kind: input, shape index: {}]   ;;  %s851_s2 = inlined_call_operand.vmem [shape: f32[1,32], index: 2, kind: input, shape index: {}]   ;;  %s852_s3 = inlined_call_operand.vmem [shape: f32[32,16], index: 3, kind: input, shape index: {}]   ;;  %s853_s4 = inlined_call_operand.vmem [shape: f32[1,16], index: 4, kind: input, shape index: {}]   ;;  %s854_s5 = inlined_call_operand.vmem [shape: f32[16,8], index: 5, kind: input, shape index: {}]   ;;  %s855_s6 = inlined_call_operand.vmem [shape: f32[1,8], index: 6, kind: input, shape index: {}]   ;;  %s856_s7 = inlined_call_operand.vmem [shape: f32[80,8], index: 7, kind: output, shape index: {}]  }
   0x1 LB: > { %s647_s25 = sadd.s32 4294967295, %s734_s24   ;;  %p651_p0 = scmp.ge.s32.totalorder %s734_s24, 1  ;;  %s734_s24 = sphi %s776_s24, %s17_s24  }
   0x2   : > { %p238_p1 = scmp.lt.s32.totalorder %s734_s24, 6 }
   0x4   : > { %p239_p2 = pnand %p651_p0, %p238_p1 }
   0x5   : > { %s652_s30 = sshll.u32 (!%p239_p2), %s647_s25, 1 }
   0x6   : > { %242 = sbr.rel (%p239_p2) target bundleno = 936 (0x3a8), region = 48  ;;  %p271_p3 = scmp.lt.s32.totalorder (!%p239_p2), %s652_s30, 9 }
   0xb   : > { %v287_v0 = vld [vmem:[%s850_s1 + $0x18] sm:$0xff]  ;;  %v286_v1 = vld [vmem:[%s850_s1 + $0x10] sm:$0xff]  ;;  %v285_v2 = vld [vmem:[%s850_s1 + $0x8] sm:$0xff]  ;;  %s858_s30 = smov (!%p271_p3, %s652_s30), 9  ;;  %vm295_vm0 = vcmask 261120   ;;  %vm482_vm1 = vcmask 130048  }
   0xc   : > { %683 = vmatprep.subr.mxu0 %v287_v0  ;;  %v284_v3 = vld [vmem:[%s850_s1] sm:$0xff]  ;;  %s653_s12 = sshll.u32 %s858_s30, 3  ;;  %v382_v6 = vld [vmem:[%s852_s3 + $0x18] sm:$0xff]  ;;  %v381_v7 = vld [vmem:[%s852_s3 + $0x10] sm:$0xff]  ;;  %vm564_vm2 = vcmask 64512  }
   0xd   : > { %684 = vmatpush3.msra.mxu0 %v287_v0  ;;  %s274_s15 = scalar_lea.vmem %s849_s0, %s653_s12  ;;  %694 = vmatprep.subr.mxu1 %v382_v6  ;;  %v380_v8 = vld [vmem:[%s852_s3 + $0x8] sm:$0xff]  ;;  %v379_v9 = vld [vmem:[%s852_s3] sm:$0xff]  ;;  %s280_s16 = scalar_lea.vmem %s856_s7, %s653_s12 }
   0xe   : > { %685 = vmatprep.subr.mxu0 %v286_v1  ;;  %v282_v4 = vld [vmem:[%s274_s15] sm:$0xff]  ;;  %v283_v5 = vld [vmem:[%s274_s15 + $0x8] sm:$0xff]  ;;  %695 = vmatpush3.msra.mxu1 %v382_v6 }
   0xf   : > { %686 = vmatpush3.msra.mxu0 %v286_v1  ;;  %691 = vmatprep.mubr.msk.f32.mxu0 %vm295_vm0, %v282_v4  ;;  %v656_v10 = vld [vmem:[%s851_s2] ss:$0 sm:$0xff]  ;;  %v474_v17 = vld [vmem:[%s854_s5 + $0x8] sm:$0xff] }
  0x10   : > { %687 = vmatprep.subr.mxu0 %v285_v2  ;;  %696 = vmatprep.subr.mxu1 %v381_v7  ;;  %v473_v18 = vld [vmem:[%s854_s5] sm:$0xff] }
  0x11   : > { %688 = vmatpush3.msra.mxu0 %v285_v2  ;;  %697 = vmatpush3.msra.mxu1 %v381_v7  ;;  %v659_v19 = vld [vmem:[%s853_s4] ss:$0 sm:$0xff] }
  0x12   : > { %689 = vmatprep.subr.mxu0 %v284_v3  ;;  %698 = vmatprep.subr.mxu1 %v380_v8  ;;  %v662_v27 = vld [vmem:[%s855_s6] ss:$0 sm:$0xff] }
  0x13   : > { %690 = vmatpush3.msra.mxu0 %v284_v3  ;;  %699 = vmatpush3.msra.mxu1 %v380_v8 }
  0x14   : > { %692 = vmatmul.mubr.msk.f32.vlgmr.msra.gmra.mxu0 %vm295_vm0, %v283_v5  ;;  %700 = vmatprep.subr.mxu1 %v379_v9 }
  0x15   : > { %701 = vmatpush3.msra.mxu1 %v379_v9  ;;  %705 = vmatprep.subr.mxu0 %v474_v17 }
  0x16   : > { %706 = vmatpush3.msra.mxu0 %v474_v17 }
  0x17   : > { %707 = vmatprep.subr.mxu0 %v473_v18 }
  0x18   : > { %708 = vmatpush3.msra.mxu0 %v473_v18 }
  0xd4   : > { %v693_v11 = vpop.f32.mrf.mxu0 }
  0xd5   : > { %v374_v12 = vadd.f32 %v693_v11, %v656_v10 }
  0xd6   : > { %v368_v13 = vpop.f32.mrf.mxu0 }
  0xd7   : > { %v369_v14 = vadd.f32 %v656_v10, %v368_v13  ;;  %v378_v16 = vmax.f32 %v374_v12, 0.0 }
  0xd9   : > { %v377_v15 = vmax.f32 %v369_v14, 0.0 }
  0xdb   : > { %702 = vmatprep.mubr.msk.f32.mxu1 %vm295_vm0, %v377_v15 }
  0xdc   : > { %703 = vmatmul.mubr.msk.f32.vlgmr.msra.gmra.mxu1 %vm295_vm0, %v378_v16 }
 0x19c   : > { %v704_v20 = vpop.f32.mrf.mxu1 }
 0x19d   : > { %v468_v21 = vadd.f32 %v704_v20, %v659_v19 }
 0x19e   : > { %v462_v22 = vpop.f32.mrf.mxu1 }
 0x19f   : > { %v463_v23 = vadd.f32 %v659_v19, %v462_v22  ;;  %v472_v25 = vmax.f32 %v468_v21, 0.0 }
 0x1a1   : > { %v471_v24 = vmax.f32 %v463_v23, 0.0 }
 0x1a3   : > { %709 = vmatprep.mubr.msk.f32.mxu0 %vm482_vm1, %v471_v24 }
 0x1a4   : > { %710 = vmatmul.mubr.msk.f32.vlgmr.msra.gmra.mxu0 %vm482_vm1, %v472_v25 }
 0x264   : > { %v711_v26 = vpop.f32.mrf.mxu0 }
 0x265   : > { %v561_v30 = vadd.f32 %v711_v26, %v662_v27 }
 0x266   : > { %v555_v28 = vpop.f32.mrf.mxu0 }
 0x267   : > { %v556_v29 = vadd.f32 %v662_v27, %v555_v28  ;;  %v568_v32 = vsel %vm564_vm2, %v561_v30, -inf }
 0x269   : > { %v565_v31 = vsel %vm564_vm2, %v556_v29, -inf }
 0x26a   : > { %566 = vmax.xlane.f32.xlu0 %v565_v31 }
 0x26e   : > { %569 = vmax.xlane.f32.xlu0 %v568_v32 }
 0x2f3   : > { %v567_v33 = vpop.xlane.xlu0 %566 }
 0x2f4   : > { %v571_v34 = vsub.f32 %v556_v29, %v567_v33 }
 0x2f6   : > { %v573_v35 = vmul.f32 1.442695, %v571_v34 }
 0x2f7   : > { %v570_v36 = vpop.xlane.xlu0 %569 }
 0x2f8   : > { %720 = vpow2.f32 %v573_v35  ;;  %v572_v37 = vsub.f32 %v561_v30, %v570_v36 }
 0x2fa   : > { %v575_v38 = vmul.f32 1.442695, %v572_v37 }
 0x2fc   : > { %722 = vpow2.f32 %v575_v38 }
 0x305   : > { %v721_v39 = vpop.eup %720 }
 0x306   : > { %v577_v40 = vsel %vm564_vm2, %v721_v39, 0.0 }
 0x307   : > { %578 = vadd.xlane.f32.xlu1 %v577_v40 }
 0x309   : > { %v723_v41 = vpop.eup %722 }
 0x30a   : > { %v580_v42 = vsel %vm564_vm2, %v723_v41, 0.0 }
 0x30b   : > { %581 = vadd.xlane.f32.xlu1 %v580_v42 }
 0x390   : > { %v579_v43 = vpop.xlane.xlu1 %578 }
 0x391   : > { %724 = vlog2.f32 %v579_v43 }
 0x394   : > { %v582_v44 = vpop.xlane.xlu1 %581 }
 0x395   : > { %726 = vlog2.f32 %v582_v44 }
 0x39e   : > { %v725_v45 = vpop.eup %724 }
 0x39f   : > { %v584_v46 = vmul.f32 0.6931472, %v725_v45 }
 0x3a1   : > { %v587_v47 = vsub.f32 %v571_v34, %v584_v46 }
 0x3a2   : > { %v727_v48 = vpop.eup %726 }
 0x3a3   : > { %589 = vst.msk [vmem:[%s280_s16] sm:$0xff] %vm564_vm2, %v587_v47  ;;  %v586_v49 = vmul.f32 0.6931472, %v727_v48 }
 0x3a5   : > { %v588_v50 = vsub.f32 %v572_v37, %v586_v49 }
 0x3a7   : > { %590 = vst.msk [vmem:[%s280_s16 + $0x8] sm:$0xff] %vm564_vm2, %v588_v50 }
 0x3a8 PF: > { %s17_s24 = sadd.s32 1, %s734_s24  }
 0x3a9   : > { %p14_p4 = scmp.ge.s32.totalorder %s17_s24, 7  }
 0x3ab   :  { %16 = sbr.rel (!%p14_p4) target bundleno = 1 (0x1), region = 78 }

</bundles_post_ra>
